<compile_context>
chip_gen: v5e
topology: v5e:2x2
jax: 0.10.0
libtpu: 0.0.40
codegen_flags: <defaults>
</compile_context>

<pallas_src>
import functools

import jax
import jax.numpy as jnp
from jax import lax
from jax.experimental import pallas as pl
from jax.experimental.pallas import tpu as pltpu

_NEG_BIG = -1e30   # finite "-inf" so exp(run_max - new_max) never produces NaN


# ------------------------ kernel 1: fused projection ------------------------ #

def _fused_projection_kernel(x_ref, w_ref, ablk_ref, st_ref):
    # st = (x @ W) @ a_block -> [N, 2*heads]; columns [0:heads) are the src
    # scores a[:d_k]·wx[n, h*d_k:(h+1)*d_k], columns [heads:2*heads) the dst
    # scores.  wx is never written back to HBM.
    wx = jnp.dot(x_ref[...], w_ref[...], preferred_element_type=jnp.float32)
    st_ref[...] = jnp.dot(wx, ablk_ref[...], preferred_element_type=jnp.float32)


# --------------- kernel 2: edge scores + online segment stats --------------- #

def _edge_stats_kernel(alpha, s_ref, t_ref, e0_ref, e1_ref, g_ref,
                       e_out_ref, max_ref, sum_ref):
    # Per edge tile: e = leaky(s[e0] + t[e1]); accumulate per-group max/sum
    # online (flash-softmax rescaling).  Edges live on the lane axis; running
    # segment stats are the output refs themselves, resident across the
    # 'arbitrary' grid axis.  Gather/scatter masks come from iota-compares on
    # compact int32 index vectors -- no HBM one-hot selectors.
    nh = s_ref.shape[0]
    g_cnt = max_ref.shape[0]
    te = e0_ref.shape[1]

    @pl.when(pl.program_id(0) == 0)
    def _():
        max_ref[...] = jnp.full(max_ref.shape, _NEG_BIG, dtype=max_ref.dtype)
        sum_ref[...] = jnp.zeros(sum_ref.shape, dtype=sum_ref.dtype)

    e0 = e0_ref[...]                       # [1, TE] int32
    e1 = e1_ref[...]
    g = g_ref[...]                         # padded lanes carry -1 -> all-False mask

    node_iota = lax.broadcasted_iota(jnp.int32, (nh, te), 0)
    s_e = jnp.sum(jnp.where(node_iota == e0, s_ref[...], 0.0),
                  axis=0, keepdims=True)   # [1, TE]
    t_e = jnp.sum(jnp.where(node_iota == e1, t_ref[...], 0.0),
                  axis=0, keepdims=True)
    e = s_e + t_e
    e = jnp.where(e > 0, e, alpha * e)     # LeakyReLU
    e_out_ref[...] = e                     # raw scores, reused by normalize pass

    grp_iota = lax.broadcasted_iota(jnp.int32, (g_cnt, te), 0)
    selg = grp_iota == g                   # [G, TE]

    run_max = max_ref[...]                                               # [G, 1]
    blk_max = jnp.max(jnp.where(selg, e, _NEG_BIG), axis=1, keepdims=True)
    new_max = jnp.maximum(run_max, blk_max)
    corr = jnp.exp(run_max - new_max)      # rescale previously accumulated sums

    max_e = jnp.sum(jnp.where(selg, new_max, 0.0), axis=0, keepdims=True)  # [1, TE]
    p = jnp.exp(e - max_e)
    blk_sum = jnp.sum(jnp.where(selg, p, 0.0), axis=1, keepdims=True)      # [G, 1]

    max_ref[...] = new_max
    sum_ref[...] = sum_ref[...] * corr + blk_sum


# -------------------- kernel 3: per-tile normalization ---------------------- #

def _edge_normalize_kernel(e_ref, g_ref, max_ref, sum_ref, out_ref):
    g_cnt = max_ref.shape[0]
    te = e_ref.shape[1]
    grp_iota = lax.broadcasted_iota(jnp.int32, (g_cnt, te), 0)
    selg = grp_iota == g_ref[...]
    max_e = jnp.sum(jnp.where(selg, max_ref[...], 0.0), axis=0, keepdims=True)
    sum_e = jnp.sum(jnp.where(selg, sum_ref[...], 0.0), axis=0, keepdims=True)
    out_ref[...] = jnp.exp(e_ref[...] - max_e) / (sum_e + 1e-16)


# --------------------------------- wrapper ---------------------------------- #

def _build_a_block(a, heads, d_k):
    # Block matrix folding the attention vector `a` into the projection:
    #   column h          -> a[:d_k] · wx[n, h*d_k:(h+1)*d_k]   (src half)
    #   column heads + h  -> a[d_k:] · wx[n, h*d_k:(h+1)*d_k]   (dst half)
    a_flat = a.reshape(2 * d_k)
    eye = jnp.eye(heads, dtype=jnp.float32)
    blk_src = jnp.einsum('hk,d->hdk', eye, a_flat[:d_k]).reshape(heads * d_k, heads)
    blk_dst = jnp.einsum('hk,d->hdk', eye, a_flat[d_k:]).reshape(heads * d_k, heads)
    return jnp.concatenate([blk_src, blk_dst], axis=1)       # [A, 2*heads]


def sp_graph_attention_forward(x, edge, params, opt, *, edge_block=128):
    """Pallas implementation of SpGraphAttentionLayer.forward (returns attention)."""
    alpha = float(opt['leaky_relu_slope'])
    heads = int(opt['heads'])
    norm_idx = int(opt['attention_norm_idx'])

    W = params['W'].astype(jnp.float32)       # [F, A]
    a = params['a'].astype(jnp.float32)       # [2*d_k, 1, 1]

    N, F = x.shape
    A = W.shape[1]
    d_k = A // heads
    E = edge.shape[1]
    Nh = N * heads                            # rows of wx.view(-1, 1, d_k)
    G = N                                     # softmax groups are node ids

    x = x.astype(jnp.float32)
    a_blk = _build_a_block(a, heads, d_k)     # [A, 2*heads]

    # ---- kernel 1: fused projection (whole-array blocks; N, F, A are tiny) ----
    st = pl.pallas_call(
        _fused_projection_kernel,
        out_shape=jax.ShapeDtypeStruct((N, 2 * heads), jnp.float32),
        grid=(1,),
        in_specs=[pl.BlockSpec((N, F), lambda i: (0, 0)),
                  pl.BlockSpec((F, A), lambda i: (0, 0)),
                  pl.BlockSpec((A, 2 * heads), lambda i: (0, 0))],
        out_specs=pl.BlockSpec((N, 2 * heads), lambda i: (0, 0)),
        compiler_params=pltpu.CompilerParams(
            dimension_semantics=("arbitrary",)),
    )(x, W, a_blk)

    # glue: flatten (node, head) -> Nh rows in the same order as view(-1,1,d_k).
    s_col = st[:, :heads].reshape(Nh, 1)      # src scores, nodes on sublanes
    t_col = st[:, heads:].reshape(Nh, 1)      # dst scores

    # ---- edge index prep: compact int32 vectors, edges on the lane axis ----
    TE = int(edge_block)
    n_blk = -(-E // TE)
    E_pad = n_blk * TE
    edge = edge.astype(jnp.int32)
    e0 = jnp.zeros((1, E_pad), jnp.int32).at[0, :E].set(edge[0])
    e1 = jnp.zeros((1, E_pad), jnp.int32).at[0, :E].set(edge[1])
    # Padded edges get group id -1 so they never touch any segment max/sum.
    gidx = jnp.full((1, E_pad), -1, jnp.int32).at[0, :E].set(edge[norm_idx])

    # ---- kernel 2: tiled edge scores + online segment max/sum ----
    e_rows, seg_max, seg_sum = pl.pallas_call(
        functools.partial(_edge_stats_kernel, alpha),
        out_shape=(jax.ShapeDtypeStruct((1, E_pad), jnp.float32),
                   jax.ShapeDtypeStruct((G, 1), jnp.float32),
                   jax.ShapeDtypeStruct((G, 1), jnp.float32)),
        grid=(n_blk,),
        in_specs=[pl.BlockSpec((Nh, 1), lambda i: (0, 0)),
                  pl.BlockSpec((Nh, 1), lambda i: (0, 0)),
                  pl.BlockSpec((1, TE), lambda i: (0, i)),
                  pl.BlockSpec((1, TE), lambda i: (0, i)),
                  pl.BlockSpec((1, TE), lambda i: (0, i))],
        out_specs=(pl.BlockSpec((1, TE), lambda i: (0, i)),
                   pl.BlockSpec((G, 1), lambda i: (0, 0)),
                   pl.BlockSpec((G, 1), lambda i: (0, 0))),
        compiler_params=pltpu.CompilerParams(
            dimension_semantics=("arbitrary",),      # carries running seg stats
            vmem_limit_bytes=32 * 1024 * 1024),      # within v5e/v6e/v7x budgets
    )(s_col, t_col, e0, e1, gidx)

    # ---- kernel 3: normalize each edge tile (independent tiles -> parallel) ----
    att_rows = pl.pallas_call(
        _edge_normalize_kernel,
        out_shape=jax.ShapeDtypeStruct((1, E_pad), jnp.float32),
        grid=(n_blk,),
        in_specs=[pl.BlockSpec((1, TE), lambda i: (0, i)),
                  pl.BlockSpec((1, TE), lambda i: (0, i)),
                  pl.BlockSpec((G, 1), lambda i: (0, 0)),
                  pl.BlockSpec((G, 1), lambda i: (0, 0))],
        out_specs=pl.BlockSpec((1, TE), lambda i: (0, i)),
        compiler_params=pltpu.CompilerParams(
            dimension_semantics=("parallel",),       # v7x: 2 TCs split the tiles
            vmem_limit_bytes=32 * 1024 * 1024),
    )(e_rows, gidx, seg_max, seg_sum)

    # lane-dense [1, E_pad] inside the kernels; [E, 1] output shape is glue.
    return att_rows[0, :E].reshape(E, 1)


# ------------------------------ example / check ----------------------------- #

def _xavier_normal(key, shape, fan_in, fan_out, gain=1.414):
    std = gain * (2.0 / (fan_in + fan_out)) ** 0.5
    return std * jax.random.normal(key, shape, dtype=jnp.float32)


if __name__ == "__main__":
    key = jax.random.PRNGKey(0)
    N, F = 32, 8          # nodes, in_features
    E = 300               # edges (padded to 3 x 128-lane tiles inside the wrapper)
    opt = {
        'leaky_relu_slope': 0.2,
        'heads': 2,
        'attention_dim': 16,
        'attention_norm_idx': 0,
    }
    A = opt['attention_dim']
    d_k = A // opt['heads']

    k1, k2, k3, k4, k5 = jax.random.split(key, 5)
    x = jax.random.normal(k1, (N, F), dtype=jnp.float32)
    W = _xavier_normal(k2, (F, A), F, A)                   # [in_features, attention_dim]
    a = _xavier_normal(k3, (2 * d_k, 1, 1), 1, 2 * d_k)    # [2*d_k, 1, 1]
    src = jax.random.randint(k4, (E,), 0, N)
    dst = jax.random.randint(k5, (E,), 0, N)
    edge = jnp.stack([src, dst]).astype(jnp.int32)         # [2, E]

    out = sp_graph_attention_forward(x, edge, {'W': W, 'a': a}, opt, edge_block=128)
    out = jax.block_until_ready(out)

    # Pure-JAX reference reproducing the PyTorch forward (same quirky indexing).
    wx_ref = x @ W
    h_flat_ref = wx_ref.reshape(N * opt['heads'], d_k)
    a_flat = a.reshape(-1)
    e_ref = h_flat_ref[edge[0]] @ a_flat[:d_k] + h_flat_ref[edge[1]] @ a_flat[d_k:]
    e_ref = jnp.where(e_ref > 0, e_ref, opt['leaky_relu_slope'] * e_ref)
    idx = edge[opt['attention_norm_idx']]
    seg_max = jax.ops.segment_max(e_ref, idx, num_segments=N)
    ex_ref = jnp.exp(e_ref - seg_max[idx])
    seg_sum = jax.ops.segment_sum(ex_ref, idx, num_segments=N)
    ref = (ex_ref / (seg_sum[idx] + 1e-16))[:, None]

    assert out.shape == (E, 1), out.shape
    err = float(jnp.max(jnp.abs(out - ref)))
    assert jnp.allclose(out, ref, atol=2e-5, rtol=1e-4), f"mismatch vs reference: {err}"
    print("KERNEL_OK")
</pallas_src>

<mosaic_0001>
module attributes {stable_mosaic.version = 11 : i64} {
  func.func @_fused_projection_kernel(%arg0: i32, %arg1: memref<32x8xf32, #tpu.memory_space<vmem>>, %arg2: memref<8x16xf32, #tpu.memory_space<vmem>>, %arg3: memref<16x4xf32, #tpu.memory_space<vmem>>, %arg4: memref<32x4xf32, #tpu.memory_space<vmem>>) attributes {dimension_semantics = [#tpu.dimension_semantics<arbitrary>], iteration_bounds = array<i64: 1>, scalar_prefetch = 0 : i64, scratch_operands = 0 : i64, tpu.core_type = #tpu.core_type<tc>, window_params = [{pipeline_mode = #tpu.pipeline_mode<synchronous>, transform_indices = @transform_0, window_bounds = array<i64: 32, 8>}, {pipeline_mode = #tpu.pipeline_mode<synchronous>, transform_indices = @transform_1, window_bounds = array<i64: 8, 16>}, {pipeline_mode = #tpu.pipeline_mode<synchronous>, transform_indices = @transform_2, window_bounds = array<i64: 16, 4>}, {pipeline_mode = #tpu.pipeline_mode<synchronous>, transform_indices = @transform_3, window_bounds = array<i64: 32, 4>}]} {
    %c0 = arith.constant 0 : index
    %c0_0 = arith.constant 0 : index
    %0 = vector.load %arg1[%c0, %c0_0] : memref<32x8xf32, #tpu.memory_space<vmem>>, vector<32x8xf32>
    %c0_1 = arith.constant 0 : index
    %c0_2 = arith.constant 0 : index
    %1 = vector.load %arg2[%c0_1, %c0_2] : memref<8x16xf32, #tpu.memory_space<vmem>>, vector<8x16xf32>
    %cst = arith.constant dense<0.000000e+00> : vector<32x16xf32>
    %2 = tpu.matmul %0, %1, %cst {dimension_numbers = #tpu.dot_dimension_numbers<[1], [0], [0], [1], [0, 0, 1, 1], [], []>} : vector<32x8xf32>, vector<8x16xf32>, vector<32x16xf32> -> vector<32x16xf32>
    %c0_3 = arith.constant 0 : index
    %c0_4 = arith.constant 0 : index
    %3 = vector.load %arg3[%c0_3, %c0_4] : memref<16x4xf32, #tpu.memory_space<vmem>>, vector<16x4xf32>
    %cst_5 = arith.constant dense<0.000000e+00> : vector<32x4xf32>
    %4 = tpu.matmul %2, %3, %cst_5 {dimension_numbers = #tpu.dot_dimension_numbers<[1], [0], [0], [1], [0, 0, 1, 1], [], []>} : vector<32x16xf32>, vector<16x4xf32>, vector<32x4xf32> -> vector<32x4xf32>
    %c0_6 = arith.constant 0 : index
    %c0_7 = arith.constant 0 : index
    %5 = vector.load %arg4[%c0_6, %c0_7] : memref<32x4xf32, #tpu.memory_space<vmem>>, vector<32x4xf32>
    tpu.vector_store %arg4[%c0_6, %c0_7], %4 {strides = array<i32>} : memref<32x4xf32, #tpu.memory_space<vmem>>, vector<32x4xf32>,
    return
  }
  func.func @transform_0(%arg0: i32) -> (i32, i32) {
    %c0_i32 = arith.constant 0 : i32
    %c0_i32_0 = arith.constant 0 : i32
    %c0_i32_1 = arith.constant 0 : i32
    return %c0_i32, %c0_i32_0 : i32, i32
  }
  func.func @transform_1(%arg0: i32) -> (i32, i32) {
    %c0_i32 = arith.constant 0 : i32
    %c0_i32_0 = arith.constant 0 : i32
    %c0_i32_1 = arith.constant 0 : i32
    return %c0_i32, %c0_i32_0 : i32, i32
  }
  func.func @transform_2(%arg0: i32) -> (i32, i32) {
    %c0_i32 = arith.constant 0 : i32
    %c0_i32_0 = arith.constant 0 : i32
    %c0_i32_1 = arith.constant 0 : i32
    return %c0_i32, %c0_i32_0 : i32, i32
  }
  func.func @transform_3(%arg0: i32) -> (i32, i32) {
    %c0_i32 = arith.constant 0 : i32
    %c0_i32_0 = arith.constant 0 : i32
    %c0_i32_1 = arith.constant 0 : i32
    return %c0_i32, %c0_i32_0 : i32, i32
  }
}

</mosaic_0001>

<bundles_post_ra>
// kernel: tpu_custom_call.1
= control target key start
LH: loop header
LB: loop body
LE: loop exit
PB: predicated region body
PF: predicated region fallthrough
CT: control target
= control target key end

     0   :  { %vm19_vm0 = vcmask 64512   ;;  %vm63_vm1 = vcmask 130048   ;;  %vm105_vm2 = vcmask 31744   ;;  %s178_s1 = inlined_call_operand.vmem [shape: f32[8,16], index: 1, kind: input, shape index: {}]   ;;  %s179_s0 = inlined_call_operand.vmem [shape: f32[32,8], index: 0, kind: input, shape index: {}]   ;;  %s180_s2 = inlined_call_operand.vmem [shape: f32[16,4], index: 2, kind: input, shape index: {}]   ;;  %s181_s3 = inlined_call_operand.vmem [shape: f32[32,4], index: 3, kind: output, shape index: {}]  }
   0x1   :  { %v18_v0 = vld [vmem:[%s178_s1] sm:$0xff]  ;;  %v15_v2 = vld [vmem:[%s179_s0 + $0x8] sm:$0xff]  ;;  %v16_v4 = vld [vmem:[%s179_s0 + $0x10] sm:$0xff] }
   0x2   :  { %v14_v1 = vld [vmem:[%s179_s0] sm:$0xff]  ;;  %47 = vmatpush.msra.mxu0 %v18_v0  ;;  %122 = vmatpush.msra.mxu3 %v18_v0  ;;  %v62_v3 = vld [vmem:[%s180_s2 + $0x8] sm:$0xff]  ;;  %v17_v5 = vld [vmem:[%s179_s0 + $0x18] sm:$0xff] }
   0x3   :  { %114 = vmatmul.msk.f32.vlgmr.msra.gmra.mxu0 %vm19_vm0, %v14_v1  ;;  %115 = vmatmul.msk.f32.vlgmr.msra.gmra.mxu3 %vm19_vm0, %v15_v2  ;;  %v61_v6 = vld [vmem:[%s180_s2] sm:$0xff] }
   0x4   :  { %90 = vmatpush.msra.mxu1 %v62_v3  ;;  %123 = vmatpush.msra.mxu2 %v62_v3 }
   0x6   :  { %91 = vmatpush.msra.mxu1 %v61_v6  ;;  %124 = vmatpush.msra.mxu2 %v61_v6 }
   0xb   :  { %116 = vmatmul.msk.f32.gmra.mxu3 %vm19_vm0, %v16_v4 }
  0x13   :  { %117 = vmatmul.msk.f32.gmra.mxu3 %vm19_vm0, %v17_v5 }
  0x80   :  { %v49_v7 = vpop.f32.mrf.mxu0 }
  0x81   :  { %118 = vmatmul.msk.f32.vlgmr.msra.gmra.mxu1 %vm63_vm1, %v49_v7 }
  0x86   :  { %v52_v8 = vpop.f32.mrf.mxu3 }
  0x89   :  { %119 = vmatmul.msk.f32.gmra.mxu1 %vm63_vm1, %v52_v8 }
  0x8e   :  { %v55_v9 = vpop.f32.mrf.mxu3 }
  0x8f   :  { %120 = vmatmul.msk.f32.vlgmr.msra.gmra.mxu2 %vm63_vm1, %v55_v9 }
  0x96   :  { %v58_v10 = vpop.f32.mrf.mxu3 }
  0x97   :  { %121 = vmatmul.msk.f32.gmra.mxu2 %vm63_vm1, %v58_v10 }
  0xfe   :  { %v93_v11 = vpop.f32.mrf.mxu1 }
  0xff   :  { %106 = vst.msk [vmem:[%s181_s3] sm:$0xff] %vm105_vm2, %v93_v11 }
 0x106   :  { %v96_v12 = vpop.f32.mrf.mxu1 }
 0x107   :  { %107 = vst.msk [vmem:[%s181_s3 + $0x8] sm:$0xff] %vm105_vm2, %v96_v12 }
 0x112   :  { %v99_v13 = vpop.f32.mrf.mxu2 }
 0x113   :  { %108 = vst.msk [vmem:[%s181_s3 + $0x10] sm:$0xff] %vm105_vm2, %v99_v13 }
 0x11a   :  { %v102_v14 = vpop.f32.mrf.mxu2 }
 0x11b   :  { %109 = vst.msk [vmem:[%s181_s3 + $0x18] sm:$0xff] %vm105_vm2, %v102_v14 }

</bundles_post_ra>
